<compile_context>
chip_gen: v6e
topology: v6e:2x2x1
jax: 0.10.0
libtpu: 0.0.40
codegen_flags: <defaults>
</compile_context>

<pallas_src>
import jax
import jax.numpy as jnp
from jax.experimental import pallas as pl
from jax.experimental.pallas import tpu as pltpu


# ---------------------------------------------------------------------------
# Fused kernel: per-metapath DenseGraphConv + ReLU + L2-normalize,
# semantic attention over metapaths, predict Linear + softmax.
# grid = (1,) — everything fits comfortably in VMEM at these sizes.
# ---------------------------------------------------------------------------
def fused_hgcn_kernel(adj_ref, x_ref, wcat_ref, w1_ref, b1_ref, w2_ref,
                      wp_ref, bp_ref, out_ref):
    P = adj_ref.shape[0]
    N = adj_ref.shape[1]
    H = w1_ref.shape[0]

    x = x_ref[...]                                             # [N, F] f32
    # One batched feature transform for ALL metapaths: [N,F] @ [F,P*H]
    xw_all = jnp.dot(x, wcat_ref[...], preferred_element_type=jnp.float32)

    w1 = w1_ref[...]        # [H, HS]
    b1 = b1_ref[...]        # [1, HS]
    w2 = w2_ref[...]        # [1, HS]   (second projection weight as a row)

    inv_n = 1.0 / N

    z_list = []
    score_list = []
    for p in range(P):      # P is tiny & static -> fully unrolled
        adj = adj_ref[p].astype(jnp.float32)                   # bf16 -> f32 (0/1 exact)

        # DGL DenseGraphConv, norm='both': D^{-1/2} A D^{-1/2} X W  (row-degree)
        deg = jnp.sum(adj, axis=1, keepdims=True)              # [N, 1]
        norm = jax.lax.rsqrt(jnp.maximum(deg, 1.0))            # EUP rsqrt

        feat = norm * xw_all[:, p * H:(p + 1) * H]             # (norm*X) @ W_p
        rst = jnp.dot(adj, feat, preferred_element_type=jnp.float32)
        h = jnp.maximum(rst * norm, 0.0)                       # ReLU

        # F.normalize(p=2, dim=1, eps=1e-12): h / max(||h||, 1e-12)
        sumsq = jnp.sum(h * h, axis=1, keepdims=True)
        z = h * jax.lax.rsqrt(jnp.maximum(sumsq, 1e-24))       # EUP rsqrt
        z_list.append(z)                                       # [N, H]

        # semantic-attention score: mean_nodes( tanh(z W1 + b1) . w2 )
        hid = jnp.tanh(jnp.dot(z, w1, preferred_element_type=jnp.float32) + b1)
        sv = jnp.sum(hid * w2, axis=-1, keepdims=True)         # [N, 1] (VPU + XLU)
        score_list.append(jnp.sum(sv, axis=0, keepdims=True) * inv_n)   # [1, 1]

    # softmax over the P metapath scores (kept as [1,1] tiles; P static)
    m = score_list[0]
    for p in range(1, P):
        m = jnp.maximum(m, score_list[p])
    exps = [jnp.exp(s - m) for s in score_list]
    denom = exps[0]
    for p in range(1, P):
        denom = denom + exps[p]
    betas = [e / denom for e in exps]                          # exact (scalar tiles)

    # (beta * Z).sum over the metapath axis
    attn = betas[0] * z_list[0]
    for p in range(1, P):
        attn = attn + betas[p] * z_list[p]                     # [N, H]

    # predict + softmax(Z2 + 1e-8, dim=1)
    z2 = (jnp.dot(attn, wp_ref[...], preferred_element_type=jnp.float32)
          + bp_ref[...] + 1e-8)                                # [N, C]
    z2 = z2 - jnp.max(z2, axis=1, keepdims=True)
    ez = jnp.exp(z2)
    out_ref[...] = ez / jnp.sum(ez, axis=1, keepdims=True)     # exact row-normalize


# ---------------------------------------------------------------------------
# Full module forward — one pallas_call, jit'd so prolog ops fuse around it.
# ---------------------------------------------------------------------------
@jax.jit
def hgcn_outer_forward(mx_stack, X, params):
    P, N, _ = mx_stack.shape
    F = X.shape[1]
    H = params["gcn_w"].shape[2]
    HS = params["sa_w1"].shape[1]
    C = params["pred_w"].shape[1]

    # Adjacency values are exactly 0/1 -> bf16 storage is exact, halves DMA bytes.
    adj_bf16 = mx_stack.astype(jnp.bfloat16)
    # Concatenate the per-metapath GCN weights: column block p of wcat == W_p.
    wcat = jnp.transpose(params["gcn_w"], (1, 0, 2)).reshape(F, P * H)
    # Second attention projection as a row vector (avoids a lane-width-1 matmul).
    w2_row = params["sa_w2"].reshape(1, HS)

    return pl.pallas_call(
        fused_hgcn_kernel,
        out_shape=jax.ShapeDtypeStruct((N, C), jnp.float32),
        grid_spec=pltpu.PrefetchScalarGridSpec(
            num_scalar_prefetch=0,
            grid=(1,),
            in_specs=[
                pl.BlockSpec((P, N, N), lambda i: (0, 0, 0)),   # adjacency stack
                pl.BlockSpec((N, F), lambda i: (0, 0)),          # X
                pl.BlockSpec((F, P * H), lambda i: (0, 0)),      # concat GCN weights
                pl.BlockSpec((H, HS), lambda i: (0, 0)),         # sa W1
                pl.BlockSpec((1, HS), lambda i: (0, 0)),         # sa b1
                pl.BlockSpec((1, HS), lambda i: (0, 0)),         # sa w2 (row)
                pl.BlockSpec((H, C), lambda i: (0, 0)),          # predict W
                pl.BlockSpec((1, C), lambda i: (0, 0)),          # predict b
            ],
            out_specs=pl.BlockSpec((N, C), lambda i: (0, 0)),
        ),
        compiler_params=pltpu.CompilerParams(
            dimension_semantics=("arbitrary",)),
    )(adj_bf16, X, wcat, params["sa_w1"], params["sa_b1"], w2_row,
      params["pred_w"], params["pred_b"])


def init_params(key, num_paths, in_size, hidden_size, out_size, sa_hidden=128):
    ks = jax.random.split(key, 6)
    scale = 0.1
    return {
        # one DenseGraphConv weight [F, H] per metapath (bias=False)
        "gcn_w": scale * jax.random.normal(ks[0], (num_paths, in_size, hidden_size),
                                           dtype=jnp.float32),
        # SemanticAttention: Linear(H, 128) + Tanh + Linear(128, 1, bias=False)
        "sa_w1": scale * jax.random.normal(ks[1], (hidden_size, sa_hidden),
                                           dtype=jnp.float32),
        "sa_b1": scale * jax.random.normal(ks[2], (1, sa_hidden), dtype=jnp.float32),
        "sa_w2": scale * jax.random.normal(ks[3], (sa_hidden, 1), dtype=jnp.float32),
        # predict: Linear(H, out_size)
        "pred_w": scale * jax.random.normal(ks[4], (hidden_size, out_size),
                                            dtype=jnp.float32),
        "pred_b": scale * jax.random.normal(ks[5], (1, out_size), dtype=jnp.float32),
    }


if __name__ == "__main__":
    # Small shapes consistent with the module: N nodes, P metapaths,
    # in_size features, hidden_size=8 (module default), num_heads=1.
    N = 16          # number of nodes
    P = 3           # number of metapaths
    IN_SIZE = 32    # input feature size
    HIDDEN = 8      # hidden_size (module default)
    OUT = 4         # out_size (number of classes)

    key = jax.random.PRNGKey(0)
    k_adj, k_x, k_par = jax.random.split(key, 3)

    # Binary reachability adjacencies + identity, clamped to 1 (as the
    # inner-compose module would produce and pass into this outer forward).
    raw = jax.random.uniform(k_adj, (P, N, N))
    adj = (raw > 0.7).astype(jnp.float32)
    eye = jnp.eye(N, dtype=jnp.float32)[None, :, :]
    mx_stack = jnp.minimum(adj + eye, 1.0)

    X = jax.random.normal(k_x, (N, IN_SIZE), dtype=jnp.float32)

    params = init_params(k_par, P, IN_SIZE, HIDDEN, OUT)

    out = hgcn_outer_forward(mx_stack, X, params)
    out = jax.block_until_ready(out)

    assert out.shape == (N, OUT)
    assert bool(jnp.all(jnp.isfinite(out)))
    # rows of a softmax sum to 1
    assert bool(jnp.allclose(jnp.sum(out, axis=1), 1.0, atol=1e-5))

    print("KERNEL_OK")
</pallas_src>

<mosaic_0001>
module attributes {stable_mosaic.version = 11 : i64} {
  func.func @fused_hgcn_kernel(%arg0: i32, %arg1: memref<3x16x16xbf16, #tpu.memory_space<vmem>>, %arg2: memref<16x32xf32, #tpu.memory_space<vmem>>, %arg3: memref<32x24xf32, #tpu.memory_space<vmem>>, %arg4: memref<8x128xf32, #tpu.memory_space<vmem>>, %arg5: memref<1x128xf32, #tpu.memory_space<vmem>>, %arg6: memref<1x128xf32, #tpu.memory_space<vmem>>, %arg7: memref<8x4xf32, #tpu.memory_space<vmem>>, %arg8: memref<1x4xf32, #tpu.memory_space<vmem>>, %arg9: memref<16x4xf32, #tpu.memory_space<vmem>>) attributes {dimension_semantics = [#tpu.dimension_semantics<arbitrary>], iteration_bounds = array<i64: 1>, scalar_prefetch = 0 : i64, scratch_operands = 0 : i64, tpu.core_type = #tpu.core_type<tc>, window_params = [{pipeline_mode = #tpu.pipeline_mode<synchronous>, transform_indices = @transform_0, window_bounds = array<i64: 3, 16, 16>}, {pipeline_mode = #tpu.pipeline_mode<synchronous>, transform_indices = @transform_1, window_bounds = array<i64: 16, 32>}, {pipeline_mode = #tpu.pipeline_mode<synchronous>, transform_indices = @transform_2, window_bounds = array<i64: 32, 24>}, {pipeline_mode = #tpu.pipeline_mode<synchronous>, transform_indices = @transform_3, window_bounds = array<i64: 8, 128>}, {pipeline_mode = #tpu.pipeline_mode<synchronous>, transform_indices = @transform_4, window_bounds = array<i64: 1, 128>}, {pipeline_mode = #tpu.pipeline_mode<synchronous>, transform_indices = @transform_5, window_bounds = array<i64: 1, 128>}, {pipeline_mode = #tpu.pipeline_mode<synchronous>, transform_indices = @transform_6, window_bounds = array<i64: 8, 4>}, {pipeline_mode = #tpu.pipeline_mode<synchronous>, transform_indices = @transform_7, window_bounds = array<i64: 1, 4>}, {pipeline_mode = #tpu.pipeline_mode<synchronous>, transform_indices = @transform_8, window_bounds = array<i64: 16, 4>}]} {
    %c0 = arith.constant 0 : index
    %c0_0 = arith.constant 0 : index
    %0 = vector.load %arg2[%c0, %c0_0] : memref<16x32xf32, #tpu.memory_space<vmem>>, vector<16x32xf32>
    %c0_1 = arith.constant 0 : index
    %c0_2 = arith.constant 0 : index
    %1 = vector.load %arg3[%c0_1, %c0_2] : memref<32x24xf32, #tpu.memory_space<vmem>>, vector<32x24xf32>
    %cst = arith.constant dense<0.000000e+00> : vector<16x24xf32>
    %2 = tpu.matmul %0, %1, %cst {dimension_numbers = #tpu.dot_dimension_numbers<[1], [0], [0], [1], [0, 0, 1, 1], [], []>} : vector<16x32xf32>, vector<32x24xf32>, vector<16x24xf32> -> vector<16x24xf32>
    %c0_3 = arith.constant 0 : index
    %c0_4 = arith.constant 0 : index
    %3 = vector.load %arg4[%c0_3, %c0_4] : memref<8x128xf32, #tpu.memory_space<vmem>>, vector<8x128xf32>
    %c0_5 = arith.constant 0 : index
    %c0_6 = arith.constant 0 : index
    %4 = vector.load %arg5[%c0_5, %c0_6] : memref<1x128xf32, #tpu.memory_space<vmem>>, vector<1x128xf32>
    %c0_7 = arith.constant 0 : index
    %c0_8 = arith.constant 0 : index
    %5 = vector.load %arg6[%c0_7, %c0_8] : memref<1x128xf32, #tpu.memory_space<vmem>>, vector<1x128xf32>
    %c0_9 = arith.constant 0 : index
    %c0_10 = arith.constant 0 : index
    %c0_11 = arith.constant 0 : index
    %6 = vector.load %arg1[%c0_9, %c0_10, %c0_11] : memref<3x16x16xbf16, #tpu.memory_space<vmem>>, vector<1x16x16xbf16>
    %7 = vector.shape_cast %6 : vector<1x16x16xbf16> to vector<16x16xbf16>
    %8 = arith.extf %7 : vector<16x16xbf16> to vector<16x16xf32>
    %cst_12 = arith.constant dense<0.000000e+00> : vector<16xf32>
    %9 = vector.multi_reduction <add>, %8, %cst_12 [1] : vector<16x16xf32> to vector<16xf32>
    %10 = vector.shape_cast %9 : vector<16xf32> to vector<16x1xf32>
    %cst_13 = arith.constant 1.000000e+00 : f32
    %11 = vector.broadcast %cst_13 : f32 to vector<16x1xf32>
    %12 = arith.maximumf %10, %11 : vector<16x1xf32>
    %13 = math.rsqrt %12 : vector<16x1xf32>
    %14 = vector.extract_strided_slice %2 {offsets = [0, 0], sizes = [16, 8], strides = [1, 1]} : vector<16x24xf32> to vector<16x8xf32>
    %15 = vector.broadcast %13 : vector<16x1xf32> to vector<16x8xf32>
    %16 = arith.mulf %15, %14 : vector<16x8xf32>
    %cst_14 = arith.constant dense<0.000000e+00> : vector<16x8xf32>
    %17 = tpu.matmul %8, %16, %cst_14 {dimension_numbers = #tpu.dot_dimension_numbers<[1], [0], [0], [1], [0, 0, 1, 1], [], []>} : vector<16x16xf32>, vector<16x8xf32>, vector<16x8xf32> -> vector<16x8xf32>
    %18 = vector.broadcast %13 : vector<16x1xf32> to vector<16x8xf32>
    %19 = arith.mulf %17, %18 : vector<16x8xf32>
    %cst_15 = arith.constant 0.000000e+00 : f32
    %20 = vector.broadcast %cst_15 : f32 to vector<16x8xf32>
    %21 = arith.maximumf %19, %20 : vector<16x8xf32>
    %22 = arith.mulf %21, %21 : vector<16x8xf32>
    %cst_16 = arith.constant dense<0.000000e+00> : vector<16xf32>
    %23 = vector.multi_reduction <add>, %22, %cst_16 [1] : vector<16x8xf32> to vector<16xf32>
    %24 = vector.shape_cast %23 : vector<16xf32> to vector<16x1xf32>
    %cst_17 = arith.constant 1.000000e-24 : f32
    %25 = vector.broadcast %cst_17 : f32 to vector<16x1xf32>
    %26 = arith.maximumf %24, %25 : vector<16x1xf32>
    %27 = math.rsqrt %26 : vector<16x1xf32>
    %28 = vector.broadcast %27 : vector<16x1xf32> to vector<16x8xf32>
    %29 = arith.mulf %21, %28 : vector<16x8xf32>
    %cst_18 = arith.constant dense<0.000000e+00> : vector<16x128xf32>
    %30 = tpu.matmul %29, %3, %cst_18 {dimension_numbers = #tpu.dot_dimension_numbers<[1], [0], [0], [1], [0, 0, 1, 1], [], []>} : vector<16x8xf32>, vector<8x128xf32>, vector<16x128xf32> -> vector<16x128xf32>
    %31 = vector.broadcast %4 : vector<1x128xf32> to vector<16x128xf32>
    %32 = arith.addf %30, %31 : vector<16x128xf32>
    %33 = math.tanh %32 : vector<16x128xf32>
    %34 = vector.broadcast %5 : vector<1x128xf32> to vector<16x128xf32>
    %35 = arith.mulf %33, %34 : vector<16x128xf32>
    %cst_19 = arith.constant dense<0.000000e+00> : vector<16xf32>
    %36 = vector.multi_reduction <add>, %35, %cst_19 [1] : vector<16x128xf32> to vector<16xf32>
    %37 = vector.shape_cast %36 : vector<16xf32> to vector<16x1xf32>
    %cst_20 = arith.constant dense<0.000000e+00> : vector<1xf32>
    %38 = vector.multi_reduction <add>, %37, %cst_20 [0] : vector<16x1xf32> to vector<1xf32>
    %39 = vector.shape_cast %38 : vector<1xf32> to vector<1x1xf32>
    %cst_21 = arith.constant 6.250000e-02 : f32
    %40 = vector.broadcast %cst_21 : f32 to vector<1x1xf32>
    %41 = arith.mulf %39, %40 : vector<1x1xf32>
    %c1 = arith.constant 1 : index
    %c0_22 = arith.constant 0 : index
    %c0_23 = arith.constant 0 : index
    %42 = vector.load %arg1[%c1, %c0_22, %c0_23] : memref<3x16x16xbf16, #tpu.memory_space<vmem>>, vector<1x16x16xbf16>
    %43 = vector.shape_cast %42 : vector<1x16x16xbf16> to vector<16x16xbf16>
    %44 = arith.extf %43 : vector<16x16xbf16> to vector<16x16xf32>
    %cst_24 = arith.constant dense<0.000000e+00> : vector<16xf32>
    %45 = vector.multi_reduction <add>, %44, %cst_24 [1] : vector<16x16xf32> to vector<16xf32>
    %46 = vector.shape_cast %45 : vector<16xf32> to vector<16x1xf32>
    %cst_25 = arith.constant 1.000000e+00 : f32
    %47 = vector.broadcast %cst_25 : f32 to vector<16x1xf32>
    %48 = arith.maximumf %46, %47 : vector<16x1xf32>
    %49 = math.rsqrt %48 : vector<16x1xf32>
    %50 = vector.extract_strided_slice %2 {offsets = [0, 8], sizes = [16, 8], strides = [1, 1]} : vector<16x24xf32> to vector<16x8xf32>
    %51 = vector.broadcast %49 : vector<16x1xf32> to vector<16x8xf32>
    %52 = arith.mulf %51, %50 : vector<16x8xf32>
    %cst_26 = arith.constant dense<0.000000e+00> : vector<16x8xf32>
    %53 = tpu.matmul %44, %52, %cst_26 {dimension_numbers = #tpu.dot_dimension_numbers<[1], [0], [0], [1], [0, 0, 1, 1], [], []>} : vector<16x16xf32>, vector<16x8xf32>, vector<16x8xf32> -> vector<16x8xf32>
    %54 = vector.broadcast %49 : vector<16x1xf32> to vector<16x8xf32>
    %55 = arith.mulf %53, %54 : vector<16x8xf32>
    %cst_27 = arith.constant 0.000000e+00 : f32
    %56 = vector.broadcast %cst_27 : f32 to vector<16x8xf32>
    %57 = arith.maximumf %55, %56 : vector<16x8xf32>
    %58 = arith.mulf %57, %57 : vector<16x8xf32>
    %cst_28 = arith.constant dense<0.000000e+00> : vector<16xf32>
    %59 = vector.multi_reduction <add>, %58, %cst_28 [1] : vector<16x8xf32> to vector<16xf32>
    %60 = vector.shape_cast %59 : vector<16xf32> to vector<16x1xf32>
    %cst_29 = arith.constant 1.000000e-24 : f32
    %61 = vector.broadcast %cst_29 : f32 to vector<16x1xf32>
    %62 = arith.maximumf %60, %61 : vector<16x1xf32>
    %63 = math.rsqrt %62 : vector<16x1xf32>
    %64 = vector.broadcast %63 : vector<16x1xf32> to vector<16x8xf32>
    %65 = arith.mulf %57, %64 : vector<16x8xf32>
    %cst_30 = arith.constant dense<0.000000e+00> : vector<16x128xf32>
    %66 = tpu.matmul %65, %3, %cst_30 {dimension_numbers = #tpu.dot_dimension_numbers<[1], [0], [0], [1], [0, 0, 1, 1], [], []>} : vector<16x8xf32>, vector<8x128xf32>, vector<16x128xf32> -> vector<16x128xf32>
    %67 = vector.broadcast %4 : vector<1x128xf32> to vector<16x128xf32>
    %68 = arith.addf %66, %67 : vector<16x128xf32>
    %69 = math.tanh %68 : vector<16x128xf32>
    %70 = vector.broadcast %5 : vector<1x128xf32> to vector<16x128xf32>
    %71 = arith.mulf %69, %70 : vector<16x128xf32>
    %cst_31 = arith.constant dense<0.000000e+00> : vector<16xf32>
    %72 = vector.multi_reduction <add>, %71, %cst_31 [1] : vector<16x128xf32> to vector<16xf32>
    %73 = vector.shape_cast %72 : vector<16xf32> to vector<16x1xf32>
    %cst_32 = arith.constant dense<0.000000e+00> : vector<1xf32>
    %74 = vector.multi_reduction <add>, %73, %cst_32 [0] : vector<16x1xf32> to vector<1xf32>
    %75 = vector.shape_cast %74 : vector<1xf32> to vector<1x1xf32>
    %cst_33 = arith.constant 6.250000e-02 : f32
    %76 = vector.broadcast %cst_33 : f32 to vector<1x1xf32>
    %77 = arith.mulf %75, %76 : vector<1x1xf32>
    %c2 = arith.constant 2 : index
    %c0_34 = arith.constant 0 : index
    %c0_35 = arith.constant 0 : index
    %78 = vector.load %arg1[%c2, %c0_34, %c0_35] : memref<3x16x16xbf16, #tpu.memory_space<vmem>>, vector<1x16x16xbf16>
    %79 = vector.shape_cast %78 : vector<1x16x16xbf16> to vector<16x16xbf16>
    %80 = arith.extf %79 : vector<16x16xbf16> to vector<16x16xf32>
    %cst_36 = arith.constant dense<0.000000e+00> : vector<16xf32>
    %81 = vector.multi_reduction <add>, %80, %cst_36 [1] : vector<16x16xf32> to vector<16xf32>
    %82 = vector.shape_cast %81 : vector<16xf32> to vector<16x1xf32>
    %cst_37 = arith.constant 1.000000e+00 : f32
    %83 = vector.broadcast %cst_37 : f32 to vector<16x1xf32>
    %84 = arith.maximumf %82, %83 : vector<16x1xf32>
    %85 = math.rsqrt %84 : vector<16x1xf32>
    %86 = vector.extract_strided_slice %2 {offsets = [0, 16], sizes = [16, 8], strides = [1, 1]} : vector<16x24xf32> to vector<16x8xf32>
    %87 = vector.broadcast %85 : vector<16x1xf32> to vector<16x8xf32>
    %88 = arith.mulf %87, %86 : vector<16x8xf32>
    %cst_38 = arith.constant dense<0.000000e+00> : vector<16x8xf32>
    %89 = tpu.matmul %80, %88, %cst_38 {dimension_numbers = #tpu.dot_dimension_numbers<[1], [0], [0], [1], [0, 0, 1, 1], [], []>} : vector<16x16xf32>, vector<16x8xf32>, vector<16x8xf32> -> vector<16x8xf32>
    %90 = vector.broadcast %85 : vector<16x1xf32> to vector<16x8xf32>
    %91 = arith.mulf %89, %90 : vector<16x8xf32>
    %cst_39 = arith.constant 0.000000e+00 : f32
    %92 = vector.broadcast %cst_39 : f32 to vector<16x8xf32>
    %93 = arith.maximumf %91, %92 : vector<16x8xf32>
    %94 = arith.mulf %93, %93 : vector<16x8xf32>
    %cst_40 = arith.constant dense<0.000000e+00> : vector<16xf32>
    %95 = vector.multi_reduction <add>, %94, %cst_40 [1] : vector<16x8xf32> to vector<16xf32>
    %96 = vector.shape_cast %95 : vector<16xf32> to vector<16x1xf32>
    %cst_41 = arith.constant 1.000000e-24 : f32
    %97 = vector.broadcast %cst_41 : f32 to vector<16x1xf32>
    %98 = arith.maximumf %96, %97 : vector<16x1xf32>
    %99 = math.rsqrt %98 : vector<16x1xf32>
    %100 = vector.broadcast %99 : vector<16x1xf32> to vector<16x8xf32>
    %101 = arith.mulf %93, %100 : vector<16x8xf32>
    %cst_42 = arith.constant dense<0.000000e+00> : vector<16x128xf32>
    %102 = tpu.matmul %101, %3, %cst_42 {dimension_numbers = #tpu.dot_dimension_numbers<[1], [0], [0], [1], [0, 0, 1, 1], [], []>} : vector<16x8xf32>, vector<8x128xf32>, vector<16x128xf32> -> vector<16x128xf32>
    %103 = vector.broadcast %4 : vector<1x128xf32> to vector<16x128xf32>
    %104 = arith.addf %102, %103 : vector<16x128xf32>
    %105 = math.tanh %104 : vector<16x128xf32>
    %106 = vector.broadcast %5 : vector<1x128xf32> to vector<16x128xf32>
    %107 = arith.mulf %105, %106 : vector<16x128xf32>
    %cst_43 = arith.constant dense<0.000000e+00> : vector<16xf32>
    %108 = vector.multi_reduction <add>, %107, %cst_43 [1] : vector<16x128xf32> to vector<16xf32>
    %109 = vector.shape_cast %108 : vector<16xf32> to vector<16x1xf32>
    %cst_44 = arith.constant dense<0.000000e+00> : vector<1xf32>
    %110 = vector.multi_reduction <add>, %109, %cst_44 [0] : vector<16x1xf32> to vector<1xf32>
    %111 = vector.shape_cast %110 : vector<1xf32> to vector<1x1xf32>
    %cst_45 = arith.constant 6.250000e-02 : f32
    %112 = vector.broadcast %cst_45 : f32 to vector<1x1xf32>
    %113 = arith.mulf %111, %112 : vector<1x1xf32>
    %114 = arith.maximumf %41, %77 : vector<1x1xf32>
    %115 = arith.maximumf %114, %113 : vector<1x1xf32>
    %116 = arith.subf %41, %115 : vector<1x1xf32>
    %117 = math.exp %116 : vector<1x1xf32>
    %118 = arith.subf %77, %115 : vector<1x1xf32>
    %119 = math.exp %118 : vector<1x1xf32>
    %120 = arith.subf %113, %115 : vector<1x1xf32>
    %121 = math.exp %120 : vector<1x1xf32>
    %122 = arith.addf %117, %119 : vector<1x1xf32>
    %123 = arith.addf %122, %121 : vector<1x1xf32>
    %124 = arith.divf %117, %123 : vector<1x1xf32>
    %125 = arith.divf %119, %123 : vector<1x1xf32>
    %126 = arith.divf %121, %123 : vector<1x1xf32>
    %127 = vector.broadcast %124 : vector<1x1xf32> to vector<16x8xf32>
    %128 = arith.mulf %127, %29 : vector<16x8xf32>
    %129 = vector.broadcast %125 : vector<1x1xf32> to vector<16x8xf32>
    %130 = arith.mulf %129, %65 : vector<16x8xf32>
    %131 = arith.addf %128, %130 : vector<16x8xf32>
    %132 = vector.broadcast %126 : vector<1x1xf32> to vector<16x8xf32>
    %133 = arith.mulf %132, %101 : vector<16x8xf32>
    %134 = arith.addf %131, %133 : vector<16x8xf32>
    %c0_46 = arith.constant 0 : index
    %c0_47 = arith.constant 0 : index
    %135 = vector.load %arg7[%c0_46, %c0_47] : memref<8x4xf32, #tpu.memory_space<vmem>>, vector<8x4xf32>
    %cst_48 = arith.constant dense<0.000000e+00> : vector<16x4xf32>
    %136 = tpu.matmul %134, %135, %cst_48 {dimension_numbers = #tpu.dot_dimension_numbers<[1], [0], [0], [1], [0, 0, 1, 1], [], []>} : vector<16x8xf32>, vector<8x4xf32>, vector<16x4xf32> -> vector<16x4xf32>
    %c0_49 = arith.constant 0 : index
    %c0_50 = arith.constant 0 : index
    %137 = vector.load %arg8[%c0_49, %c0_50] : memref<1x4xf32, #tpu.memory_space<vmem>>, vector<1x4xf32>
    %138 = vector.broadcast %137 : vector<1x4xf32> to vector<16x4xf32>
    %139 = arith.addf %136, %138 : vector<16x4xf32>
    %cst_51 = arith.constant 9.99999993E-9 : f32
    %140 = vector.broadcast %cst_51 : f32 to vector<16x4xf32>
    %141 = arith.addf %139, %140 : vector<16x4xf32>
    %cst_52 = arith.constant dense<0xFF800000> : vector<16xf32>
    %142 = vector.multi_reduction <maximumf>, %141, %cst_52 [1] : vector<16x4xf32> to vector<16xf32>
    %143 = vector.shape_cast %142 : vector<16xf32> to vector<16x1xf32>
    %144 = vector.broadcast %143 : vector<16x1xf32> to vector<16x4xf32>
    %145 = arith.subf %141, %144 : vector<16x4xf32>
    %146 = math.exp %145 : vector<16x4xf32>
    %cst_53 = arith.constant dense<0.000000e+00> : vector<16xf32>
    %147 = vector.multi_reduction <add>, %146, %cst_53 [1] : vector<16x4xf32> to vector<16xf32>
    %148 = vector.shape_cast %147 : vector<16xf32> to vector<16x1xf32>
    %149 = vector.broadcast %148 : vector<16x1xf32> to vector<16x4xf32>
    %150 = arith.divf %146, %149 : vector<16x4xf32>
    %c0_54 = arith.constant 0 : index
    %c0_55 = arith.constant 0 : index
    %151 = vector.load %arg9[%c0_54, %c0_55] : memref<16x4xf32, #tpu.memory_space<vmem>>, vector<16x4xf32>
    tpu.vector_store %arg9[%c0_54, %c0_55], %150 {strides = array<i32>} : memref<16x4xf32, #tpu.memory_space<vmem>>, vector<16x4xf32>,
    return
  }
  func.func @transform_0(%arg0: i32) -> (i32, i32, i32) {
    %c0_i32 = arith.constant 0 : i32
    %c0_i32_0 = arith.constant 0 : i32
    %c0_i32_1 = arith.constant 0 : i32
    %c0_i32_2 = arith.constant 0 : i32
    return %c0_i32, %c0_i32_0, %c0_i32_1 : i32, i32, i32
  }
  func.func @transform_1(%arg0: i32) -> (i32, i32) {
    %c0_i32 = arith.constant 0 : i32
    %c0_i32_0 = arith.constant 0 : i32
    %c0_i32_1 = arith.constant 0 : i32
    return %c0_i32, %c0_i32_0 : i32, i32
  }
  func.func @transform_2(%arg0: i32) -> (i32, i32) {
    %c0_i32 = arith.constant 0 : i32
    %c0_i32_0 = arith.constant 0 : i32
    %c0_i32_1 = arith.constant 0 : i32
    return %c0_i32, %c0_i32_0 : i32, i32
  }
  func.func @transform_3(%arg0: i32) -> (i32, i32) {
    %c0_i32 = arith.constant 0 : i32
    %c0_i32_0 = arith.constant 0 : i32
    %c0_i32_1 = arith.constant 0 : i32
    return %c0_i32, %c0_i32_0 : i32, i32
  }
  func.func @transform_4(%arg0: i32) -> (i32, i32) {
    %c0_i32 = arith.constant 0 : i32
    %c0_i32_0 = arith.constant 0 : i32
    %c0_i32_1 = arith.constant 0 : i32
    return %c0_i32, %c0_i32_0 : i32, i32
  }
  func.func @transform_5(%arg0: i32) -> (i32, i32) {
    %c0_i32 = arith.constant 0 : i32
    %c0_i32_0 = arith.constant 0 : i32
    %c0_i32_1 = arith.constant 0 : i32
    return %c0_i32, %c0_i32_0 : i32, i32
  }
  func.func @transform_6(%arg0: i32) -> (i32, i32) {
    %c0_i32 = arith.constant 0 : i32
    %c0_i32_0 = arith.constant 0 : i32
    %c0_i32_1 = arith.constant 0 : i32
    return %c0_i32, %c0_i32_0 : i32, i32
  }
  func.func @transform_7(%arg0: i32) -> (i32, i32) {
    %c0_i32 = arith.constant 0 : i32
    %c0_i32_0 = arith.constant 0 : i32
    %c0_i32_1 = arith.constant 0 : i32
    return %c0_i32, %c0_i32_0 : i32, i32
  }
  func.func @transform_8(%arg0: i32) -> (i32, i32) {
    %c0_i32 = arith.constant 0 : i32
    %c0_i32_0 = arith.constant 0 : i32
    %c0_i32_1 = arith.constant 0 : i32
    return %c0_i32, %c0_i32_0 : i32, i32
  }
}

</mosaic_0001>

<bundles_post_ra>
// kernel: hgcn_outer_forward.1
= control target key start
LH: loop header
LB: loop body
LE: loop exit
PB: predicated region body
PF: predicated region fallthrough
CT: control target
= control target key end

     0   :  { %vm35_vm0 = vcmask 261120   ;;  %vm124_vm1 = vcmask 130048   ;;  %vm224_vm2 = vcmask 64512   ;;  %vm906_vm3 = vcmask 31744   ;;  %s1289_s2 = inlined_call_operand.vmem [shape: f32[32,24], index: 2, kind: input, shape index: {}]   ;;  %s1290_s1 = inlined_call_operand.vmem [shape: f32[16,32], index: 1, kind: input, shape index: {}]   ;;  %s1291_s0 = inlined_call_operand.vmem [shape: bf16[3,16,16], index: 0, kind: input, shape index: {}]   ;;  %s1292_s3 = inlined_call_operand.vmem [shape: f32[8,128], index: 3, kind: input, shape index: {}]   ;;  %s1293_s4 = inlined_call_operand.vmem [shape: f32[1,128], index: 4, kind: input, shape index: {}]   ;;  %s1294_s5 = inlined_call_operand.vmem [shape: f32[1,128], index: 5, kind: input, shape index: {}]   ;;  %s1295_s6 = inlined_call_operand.vmem [shape: f32[8,4], index: 6, kind: input, shape index: {}]   ;;  %s1296_s7 = inlined_call_operand.vmem [shape: f32[1,4], index: 7, kind: input, shape index: {}]   ;;  %s1297_s8 = inlined_call_operand.vmem [shape: f32[16,4], index: 8, kind: output, shape index: {}]  }
   0x1   :  { %v34_v0 = vld [vmem:[%s1289_s2 + $0x18] sm:$0xff]  ;;  %v33_v1 = vld [vmem:[%s1289_s2 + $0x10] sm:$0xff]  ;;  %v29_v2 = vld [vmem:[%s1290_s1] sm:$0xff] }
   0x2   :  { %1002 = vmatprep.subr.mxu0 %v34_v0  ;;  %v32_v3 = vld [vmem:[%s1289_s2 + $0x8] sm:$0xff]  ;;  %1010 = vmatprep.mubr.msk.f32.mxu0 %vm35_vm0, %v29_v2  ;;  %v1176_v5 = vld [vmem:[%s1291_s0 + $0x10] sm:$0xff]   ;;  %v31_v9 = vld [vmem:[%s1289_s2] sm:$0xff] }
   0x3   :  { %1003 = vmatpush3.msra.mxu0 %v34_v0  ;;  %v1171_v4 = vld [vmem:[%s1291_s0 + $0x8] sm:$0xff]   ;;  %v969_v7 = vunpack.c.h.bf16 %v1176_v5  ;;  %v968_v10 = vunpack.c.l.bf16 %v1176_v5  ;;  %v1188_v11 = vld [vmem:[%s1291_s0] sm:$0xff]   ;;  %s1108_s0 = smov 120  }
   0x4   :  { %1004 = vmatprep.subr.mxu0 %v33_v1  ;;  %v965_v6 = vunpack.c.h.bf16 %v1171_v4  ;;  %v964_v8 = vunpack.c.l.bf16 %v1171_v4  ;;  %v30_v14 = vld [vmem:[%s1290_s1 + $0x8] sm:$0xff]  ;;  %v960_v15 = vunpack.c.l.bf16 %v1188_v11  ;;  %v961_v17 = vunpack.c.h.bf16 %v1188_v11  ;;  %s1109_s1 = smov 112   ;;  %v117_v61 = vld [vmem:[%s1292_s3] sm:$0xff] }
   0x5   :  { %1005 = vmatpush3.msra.mxu0 %v33_v1  ;;  %v575_v13 = vsel %vm124_vm1, %v969_v7, 0.0  ;;  %v572_v18 = vsel %vm124_vm1, %v968_v10, 0.0 }
   0x6   :  { %1006 = vmatprep.subr.mxu0 %v32_v3  ;;  %v354_v12 = vsel %vm124_vm1, %v965_v6, 0.0  ;;  %576 = vadd.xlane.f32.xlu1 %v575_v13  ;;  %v351_v16 = vsel %vm124_vm1, %v964_v8, 0.0  ;;  %v128_v19 = vsel %vm124_vm1, %v961_v17, 0.0  ;;  %v125_v20 = vsel %vm124_vm1, %v960_v15, 0.0 }
   0x7   :  { %1007 = vmatpush3.msra.mxu0 %v32_v3  ;;  %355 = vadd.xlane.f32.xlu0 %v354_v12 }
   0x8   :  { %1008 = vmatprep.subr.mxu0 %v31_v9  ;;  %1017 = vmatprep.mubr.msk.f32.mxu1 %vm124_vm1, %v960_v15 }
   0x9   :  { %1009 = vmatpush3.msra.mxu0 %v31_v9 }
   0xa   :  { %1011 = vmatmul.mubr.msk.f32.vlgmr.msra.gmra.mxu0 %vm35_vm0, %v30_v14  ;;  %573 = vadd.xlane.f32.xlu1 %v572_v18 }
   0xb   :  { %352 = vadd.xlane.f32.xlu0 %v351_v16  ;;  %1029 = vmatprep.mubr.msk.f32.mxu0 %vm124_vm1, %v964_v8 }
   0xe   :  { %126 = vadd.xlane.f32.xlu1 %v125_v20 }
   0xf   :  { %129 = vadd.xlane.f32.xlu0 %v128_v19 }
  0x8f   :  { %v577_v22 = vpop.xlane.xlu1 %576 }
  0x90   :  { %v356_v21 = vpop.xlane.xlu0 %355  ;;  %v579_v27 = vmax.f32 %v577_v22, 1.0 }
  0x91   :  { %v358_v26 = vmax.f32 %v356_v21, 1.0 }
  0x93   :  { %v574_v24 = vpop.xlane.xlu1 %573  ;;  %1056 = vrsqrt.f32 %v358_v26 }
  0x94   :  { %v353_v23 = vpop.xlane.xlu0 %352  ;;  %1058 = vrsqrt.f32 %v579_v27  ;;  %v578_v32 = vmax.f32 %v574_v24, 1.0 }
  0x95   :  { %v357_v31 = vmax.f32 %v353_v23, 1.0 }
  0x97   :  { %v127_v28 = vpop.xlane.xlu1 %126 }
  0x98   :  { %v130_v25 = vpop.xlane.xlu0 %129  ;;  %v131_v30 = vmax.f32 %v127_v28, 1.0 }
  0x99   :  { %v132_v29 = vmax.f32 %v130_v25, 1.0 }
  0x9b   :  { %1060 = vrsqrt.f32 %v132_v29 }
  0x9c   :  { %1062 = vrsqrt.f32 %v131_v30 }
  0x9d   :  { %1064 = vrsqrt.f32 %v357_v31 }
  0x9e   :  { %1066 = vrsqrt.f32 %v578_v32 }
  0xa0   :  { %v1057_v33 = vpop.eup %1056 }
  0xa1   :  { %v1210_v34 = vpop.eup %1058 }
  0xa8   :  { %v1061_v35 = vpop.eup %1060 }
  0xa9   :  { %v1063_v36 = vpop.eup %1062 }
  0xaa   :  { %v1065_v42 = vpop.eup %1064 }
  0xab   :  { %v1067_v45 = vpop.eup %1066 }
  0xca   :  { %v1012_v37 = vpop.f32.mrf.mxu0 }
  0xcb   :  { %v362_v38 = vmul.f32 %v1057_v33, %v1012_v37  ;;  %v583_v39 = vmul.f32 %v1210_v34, %v1012_v37  ;;  %v136_v40 = vmul.f32 %v1061_v35, %v1012_v37 }
  0xcc   :  { %v108_v41 = vpop.f32.mrf.mxu0 }
  0xcd   :  { %v135_v43 = vmul.f32 %v1063_v36, %v108_v41  ;;  %367 = vrot.lane.b32.xlu0 %v362_v38, %s1108_s0  ;;  %1013 = vmatprep.subr.mxu1 %v136_v40  ;;  %v361_v44 = vmul.f32 %v1065_v42, %v108_v41  ;;  %v582_v46 = vmul.f32 %v1067_v45, %v108_v41 }
  0xce   :  { %588 = vrot.lane.b32.xlu1 %v583_v39, %s1109_s1  ;;  %1014 = vmatpush3.msra.mxu1 %v136_v40 }
  0xcf   :  { %1015 = vmatprep.subr.mxu1 %v135_v43 }
  0xd0   :  { %1016 = vmatpush3.msra.mxu1 %v135_v43 }
  0xd1   :  { %1018 = vmatmul.mubr.msk.f32.vlgmr.msra.gmra.mxu1 %vm124_vm1, %v961_v17  ;;  %1020 = vmatprep.subr.mxu1 %v117_v61 }
  0xd2   :  { %365 = vrot.lane.b32.xlu1 %v361_v44, %s1108_s0  ;;  %1021 = vmatpush3.msra.mxu1 %v117_v61 }
  0xd3   :  { %1032 = vmatprep.subr.mxu1 %v117_v61 }
  0xd6   :  { %586 = vrot.lane.b32.xlu1 %v582_v46, %s1109_s1 }
 0x13f   :  { %v368_v47 = vpop.permute.xlu0 %367 }
 0x140   :  { %v589_v48 = vpop.permute.xlu1 %588  ;;  %1025 = vmatprep.subr.mxu0 %v368_v47 }
 0x141   :  { %1026 = vmatpush3.msra.mxu0 %v368_v47  ;;  %v942_v47 = vld [vmem:[%s1294_s5] ss:$0 sm:$0xff] }
 0x144   :  { %v366_v49 = vpop.permute.xlu1 %365 }
 0x145   :  { %1027 = vmatprep.subr.mxu0 %v366_v49 }
 0x146   :  { %1028 = vmatpush3.msra.mxu0 %v366_v49 }
 0x147   :  { %1030 = vmatmul.mubr.msk.f32.vlgmr.msra.gmra.mxu0 %vm124_vm1, %v965_v6  ;;  %1037 = vmatprep.subr.mxu0 %v589_v48 }
 0x148   :  { %1038 = vmatpush3.msra.mxu0 %v589_v48  ;;  %v587_v50 = vpop.permute.xlu1 %586  ;;  %1041 = vmatprep.mubr.msk.f32.mxu0 %vm124_vm1, %v968_v10 }
 0x149   :  { %1039 = vmatprep.subr.mxu0 %v587_v50 }
 0x14a   :  { %1040 = vmatpush3.msra.mxu0 %v587_v50 }
 0x14b   :  { %1042 = vmatmul.mubr.msk.f32.vlgmr.msra.gmra.mxu0 %vm124_vm1, %v969_v7 }
 0x191   :  { %v1019_v51 = vpop.f32.mrf.mxu1 }
 0x192   :  { %v219_v52 = vmul.f32 %v1061_v35, %v1019_v51 }
 0x193   :  { %v209_v53 = vpop.f32.mrf.mxu1 }
 0x194   :  { %v221_v54 = vmax.f32 %v219_v52, 0.0  ;;  %v218_v55 = vmul.f32 %v1063_v36, %v209_v53 }
 0x196   :  { %v220_v56 = vmax.f32 %v218_v55, 0.0  ;;  %v223_v57 = vmul.f32 %v221_v54, %v221_v54 }
 0x198   :  { %v228_v58 = vsel %vm224_vm2, %v223_v57, 0.0  ;;  %v222_v59 = vmul.f32 %v220_v56, %v220_v56 }
 0x199   :  { %229 = vadd.xlane.f32.xlu1 %v228_v58 }
 0x19a   :  { %v225_v60 = vsel %vm224_vm2, %v222_v59, 0.0 }
 0x19b   :  { %226 = vadd.xlane.f32.xlu0 %v225_v60 }
 0x207   :  { %v1031_v62 = vpop.f32.mrf.mxu0 }
 0x208   :  { %v453_v63 = vmul.f32 %v1057_v33, %v1031_v62 }
 0x209   :  { %v443_v0 = vpop.f32.mrf.mxu0 }
 0x20a   :  { %v455_v1 = vmax.f32 %v453_v63, 0.0  ;;  %v452_v2 = vmul.f32 %v1065_v42, %v443_v0  ;;  %v939_v42 = vld [vmem:[%s1293_s4] ss:$0 sm:$0xff] }
 0x20b   :  { %v1043_v3 = vpop.f32.mrf.mxu0 }
 0x20c   :  { %v454_v4 = vmax.f32 %v452_v2, 0.0  ;;  %v674_v5 = vmul.f32 %v1210_v34, %v1043_v3  ;;  %v457_v6 = vmul.f32 %v455_v1, %v455_v1 }
 0x20d   :  { %v664_v7 = vpop.f32.mrf.mxu0 }
 0x20e   :  { %v676_v8 = vmax.f32 %v674_v5, 0.0  ;;  %v673_v9 = vmul.f32 %v1067_v45, %v664_v7  ;;  %v461_v10 = vsel %vm224_vm2, %v457_v6, 0.0  ;;  %v456_v11 = vmul.f32 %v454_v4, %v454_v4 }
 0x20f   :  { %462 = vadd.xlane.f32.xlu0 %v461_v10 }
 0x210   :  { %v675_v12 = vmax.f32 %v673_v9, 0.0  ;;  %v678_v13 = vmul.f32 %v676_v8, %v676_v8  ;;  %v458_v14 = vsel %vm224_vm2, %v456_v11, 0.0 }
 0x212   :  { %v682_v15 = vsel %vm224_vm2, %v678_v13, 0.0  ;;  %v677_v16 = vmul.f32 %v675_v12, %v675_v12 }
 0x213   :  { %459 = vadd.xlane.f32.xlu0 %v458_v14  ;;  %683 = vadd.xlane.f32.xlu1 %v682_v15 }
 0x214   :  { %v679_v17 = vsel %vm224_vm2, %v677_v16, 0.0 }
 0x217   :  { %680 = vadd.xlane.f32.xlu0 %v679_v17 }
 0x222   :  { %v230_v18 = vpop.xlane.xlu1 %229 }
 0x223   :  { %v232_v19 = vmax.f32 %v230_v18, 1e-24 }
 0x224   :  { %v227_v20 = vpop.xlane.xlu0 %226 }
 0x225   :  { %v231_v21 = vmax.f32 %v227_v20, 1e-24  ;;  %1068 = vrsqrt.f32 %v232_v19 }
 0x227   :  { %1070 = vrsqrt.f32 %v231_v21 }
 0x232   :  { %v1069_v22 = vpop.eup %1068 }
 0x233   :  { %v1235_v25 = vmul.f32 %v1069_v22, %v221_v54 }
 0x234   :  { %v1071_v23 = vpop.eup %1070 }
 0x235   :  { %v1233_v24 = vmul.f32 %v1071_v23, %v220_v56 }
 0x237   :  { %1022 = vmatprep.mubr.msk.f32.mxu1 %vm224_vm2, %v1233_v24 }
 0x238   :  { %1023 = vmatmul.mubr.msk.f32.vlgmr.msra.gmra.mxu1 %vm224_vm2, %v1235_v25 }
 0x239   :  { %1033 = vmatpush3.msra.mxu1 %v117_v61 }
 0x23a   :  { %1044 = vmatprep.subr.mxu1 %v117_v61 }
 0x298   :  { %v463_v26 = vpop.xlane.xlu0 %462 }
 0x299   :  { %v465_v27 = vmax.f32 %v463_v26, 1e-24 }
 0x29b   :  { %1072 = vrsqrt.f32 %v465_v27 }
 0x29c   :  { %v460_v28 = vpop.xlane.xlu0 %459  ;;  %v684_v29 = vpop.xlane.xlu1 %683 }
 0x29d   :  { %v464_v30 = vmax.f32 %v460_v28, 1e-24  ;;  %v686_v31 = vmax.f32 %v684_v29, 1e-24 }
 0x29f   :  { %1074 = vrsqrt.f32 %v464_v30 }
 0x2a0   :  { %v681_v32 = vpop.xlane.xlu0 %680  ;;  %1076 = vrsqrt.f32 %v686_v31 }
 0x2a1   :  { %v685_v33 = vmax.f32 %v681_v32, 1e-24 }
 0x2a3   :  { %1078 = vrsqrt.f32 %v685_v33 }
 0x2a8   :  { %v1073_v34 = vpop.eup %1072 }
 0x2a9   :  { %v1243_v37 = vmul.f32 %v1073_v34, %v455_v1 }
 0x2ac   :  { %v1075_v35 = vpop.eup %1074 }
 0x2ad   :  { %v1241_v36 = vmul.f32 %v1075_v35, %v454_v4  ;;  %v1077_v38 = vpop.eup %1076  ;;  %v815_v4 = vld [vmem:[%s1295_s6] sm:$0xff] }
 0x2ae   :  { %v1251_v41 = vmul.f32 %v1077_v38, %v676_v8  ;;  %1049 = vmatprep.subr.mxu0 %v815_v4 }
 0x2af   :  { %1034 = vmatprep.mubr.msk.f32.mxu1 %vm224_vm2, %v1241_v36  ;;  %1050 = vmatpush3.msra.mxu0 %v815_v4 }
 0x2b0   :  { %v1079_v39 = vpop.eup %1078  ;;  %1035 = vmatmul.mubr.msk.f32.vlgmr.msra.gmra.mxu1 %vm224_vm2, %v1243_v37 }
 0x2b1   :  { %1045 = vmatpush3.msra.mxu1 %v117_v61  ;;  %v1249_v40 = vmul.f32 %v1079_v39, %v675_v12 }
 0x2b3   :  { %1046 = vmatprep.mubr.msk.f32.mxu1 %vm224_vm2, %v1249_v40 }
 0x2b4   :  { %1047 = vmatmul.mubr.msk.f32.vlgmr.msra.gmra.mxu1 %vm224_vm2, %v1251_v41 }
 0x2f8   :  { %v1024_v43 = vpop.f32.mrf.mxu1 }
 0x2f9   :  { %v321_v44 = vadd.f32 %v1024_v43, %v939_v42 }
 0x2fa   :  { %v315_v45 = vpop.f32.mrf.mxu1 }
 0x2fb   :  { %1080 = vtanh.f32 %v321_v44  ;;  %v316_v46 = vadd.f32 %v939_v42, %v315_v45 }
 0x2fd   :  { %1082 = vtanh.f32 %v316_v46 }
 0x308   :  { %v1081_v48 = vpop.eup %1080 }
 0x309   :  { %v333_v49 = vmul.f32 %v1081_v48, %v942_v47 }
 0x30a   :  { %v1083_v50 = vpop.eup %1082 }
 0x30b   :  { %336 = vadd.xlane.f32.xlu1 %v333_v49  ;;  %v332_v51 = vmul.f32 %v1083_v50, %v942_v47 }
 0x30d   :  { %334 = vadd.xlane.f32.xlu0 %v332_v51 }
 0x370   :  { %v1036_v52 = vpop.f32.mrf.mxu1 }
 0x371   :  { %v548_v53 = vadd.f32 %v1036_v52, %v939_v42 }
 0x372   :  { %v542_v54 = vpop.f32.mrf.mxu1 }
 0x373   :  { %1084 = vtanh.f32 %v548_v53  ;;  %v543_v55 = vadd.f32 %v939_v42, %v542_v54 }
 0x374   :  { %v1048_v56 = vpop.f32.mrf.mxu1 }
 0x375   :  { %1086 = vtanh.f32 %v543_v55  ;;  %v769_v57 = vadd.f32 %v1048_v56, %v939_v42 }
 0x376   :  { %v763_v58 = vpop.f32.mrf.mxu1 }
 0x377   :  { %1088 = vtanh.f32 %v769_v57  ;;  %v764_v59 = vadd.f32 %v939_v42, %v763_v58 }
 0x379   :  { %1090 = vtanh.f32 %v764_v59 }
 0x380   :  { %v1085_v60 = vpop.eup %1084 }
 0x381   :  { %v554_v61 = vmul.f32 %v1085_v60, %v942_v47 }
 0x382   :  { %v1087_v62 = vpop.eup %1086 }
 0x383   :  { %557 = vadd.xlane.f32.xlu1 %v554_v61  ;;  %v553_v63 = vmul.f32 %v1087_v62, %v942_v47 }
 0x384   :  { %v1089_v0 = vpop.eup %1088 }
 0x385   :  { %555 = vadd.xlane.f32.xlu0 %v553_v63  ;;  %v775_v1 = vmul.f32 %v1089_v0, %v942_v47 }
 0x386   :  { %v1091_v2 = vpop.eup %1090 }
 0x387   :  { %778 = vadd.xlane.f32.xlu1 %v775_v1  ;;  %v774_v3 = vmul.f32 %v1091_v2, %v942_v47 }
 0x389   :  { %776 = vadd.xlane.f32.xlu0 %v774_v3 }
 0x394   :  { %v337_v6 = vpop.xlane.xlu1 %336 }
 0x396   :  { %v335_v5 = vpop.xlane.xlu0 %334 }
 0x397   :  { %v338_v7 = vadd.f32 %v337_v6, %v335_v5 }
 0x399   :  { %v339_v8 = vrot.slane %v338_v7, 4 }
 0x39b   :  { %v340_v9 = vadd.f32 %v339_v8, %v338_v7 }
 0x39d   :  { %v341_v12 = vrot.slane %v340_v9, 2 }
 0x39f   :  { %v342_v17 = vadd.f32 %v341_v12, %v340_v9 }
 0x3a1   :  { %v343_v22 = vrot.slane %v342_v17, 1 }
 0x3a3   :  { %v344_v29 = vadd.f32 %v343_v22, %v342_v17 }
 0x3a5   :  { %v345_v34 = vmul.f32 0.0625, %v344_v29 }
 0x40c   :  { %v558_v10 = vpop.xlane.xlu1 %557 }
 0x40e   :  { %v556_v11 = vpop.xlane.xlu0 %555 }
 0x40f   :  { %v559_v13 = vadd.f32 %v558_v10, %v556_v11 }
 0x410   :  { %v779_v15 = vpop.xlane.xlu1 %778 }
 0x411   :  { %v560_v14 = vrot.slane %v559_v13, 4 }
 0x412   :  { %v777_v16 = vpop.xlane.xlu0 %776 }
 0x413   :  { %v561_v18 = vadd.f32 %v560_v14, %v559_v13  ;;  %v780_v19 = vadd.f32 %v779_v15, %v777_v16 }
 0x415   :  { %v562_v20 = vrot.slane %v561_v18, 2  ;;  %v781_v21 = vrot.slane %v780_v19, 4 }
 0x417   :  { %v563_v23 = vadd.f32 %v562_v20, %v561_v18  ;;  %v782_v26 = vadd.f32 %v781_v21, %v780_v19 }
 0x419   :  { %v564_v27 = vrot.slane %v563_v23, 1  ;;  %v783_v28 = vrot.slane %v782_v26, 2 }
 0x41b   :  { %v565_v30 = vadd.f32 %v564_v27, %v563_v23  ;;  %v784_v31 = vadd.f32 %v783_v28, %v782_v26 }
 0x41d   :  { %v566_v32 = vmul.f32 0.0625, %v565_v30  ;;  %v785_v33 = vrot.slane %v784_v31, 1 }
 0x41f   :  { %v786_v35 = vadd.f32 %v785_v33, %v784_v31  ;;  %v788_v38 = vmax.f32 %v345_v34, %v566_v32 }
 0x421   :  { %v787_v39 = vmul.f32 0.0625, %v786_v35 }
 0x423   :  { %v789_v42 = vmax.f32 %v788_v38, %v787_v39 }
 0x425   :  { %v790_v43 = vsub.f32 %v345_v34, %v789_v42  ;;  %v793_v44 = vsub.f32 %v566_v32, %v789_v42  ;;  %v796_v45 = vsub.f32 %v787_v39, %v789_v42 }
 0x427   :  { %v791_v46 = vmul.f32 1.442695, %v790_v43  ;;  %v794_v47 = vmul.f32 1.442695, %v793_v44  ;;  %v797_v48 = vmul.f32 1.442695, %v796_v45 }
 0x429   :  { %1092 = vpow2.f32 %v791_v46 }
 0x42a   :  { %1094 = vpow2.f32 %v794_v47 }
 0x42b   :  { %1096 = vpow2.f32 %v797_v48 }
 0x436   :  { %v1093_v49 = vpop.eup %1092 }
 0x437   :  { %v1095_v50 = vpop.eup %1094 }
 0x438   :  { %v799_v51 = vadd.f32 %v1095_v50, %v1093_v49  ;;  %v1097_v52 = vpop.eup %1096 }
 0x43a   :  { %v800_v53 = vadd.f32 %v1097_v52, %v799_v51 }
 0x43c   :  { %1098 = vrcp.f32 %v800_v53 }
 0x449   :  { %v1099_v54 = vpop.eup %1098 }
 0x44a   :  { %v802_v55 = vmul.f32 %v1099_v54, %v1093_v49  ;;  %v803_v56 = vmul.f32 %v1099_v54, %v1095_v50  ;;  %v804_v57 = vmul.f32 %v1099_v54, %v1097_v52 }
 0x44c   :  { %v805_v58 = vmul.f32 %v802_v55, %v1233_v24  ;;  %v806_v59 = vmul.f32 %v802_v55, %v1235_v25  ;;  %v807_v60 = vmul.f32 %v803_v56, %v1241_v36  ;;  %v808_v61 = vmul.f32 %v803_v56, %v1243_v37  ;;  %v955_v24 = vld [vmem:[%s1296_s7] ss:$0 sm:$0xff] }
 0x44d   :  { %v811_v63 = vmul.f32 %v804_v57, %v1249_v40  ;;  %v812_v0 = vmul.f32 %v804_v57, %v1251_v41 }
 0x44e   :  { %v809_v62 = vadd.f32 %v807_v60, %v805_v58  ;;  %v810_v1 = vadd.f32 %v808_v61, %v806_v59 }
 0x450   :  { %v813_v2 = vadd.f32 %v811_v63, %v809_v62  ;;  %v814_v3 = vadd.f32 %v812_v0, %v810_v1 }
 0x452   :  { %1051 = vmatprep.mubr.msk.f32.mxu0 %vm224_vm2, %v813_v2 }
 0x453   :  { %1052 = vmatmul.mubr.msk.f32.vlgmr.msra.gmra.mxu0 %vm224_vm2, %v814_v3 }
 0x513   :  { %v1053_v25 = vpop.f32.mrf.mxu0 }
 0x514   :  { %v901_v36 = vadd.f32 %v1053_v25, %v955_v24 }
 0x515   :  { %v895_v4 = vpop.f32.mrf.mxu0 }
 0x516   :  { %v905_v37 = vadd.f32 1e-08, %v901_v36  ;;  %v896_v5 = vadd.f32 %v955_v24, %v895_v4 }
 0x518   :  { %v904_v40 = vadd.f32 1e-08, %v896_v5  ;;  %v910_v41 = vsel %vm906_vm3, %v905_v37, -inf }
 0x519   :  { %911 = vmax.xlane.f32.xlu1 %v910_v41 }
 0x51a   :  { %v907_v6 = vsel %vm906_vm3, %v904_v40, -inf }
 0x51b   :  { %908 = vmax.xlane.f32.xlu0 %v907_v6 }
 0x5a2   :  { %v912_v7 = vpop.xlane.xlu1 %911 }
 0x5a3   :  { %v914_v8 = vsub.f32 %v905_v37, %v912_v7 }
 0x5a4   :  { %v909_v9 = vpop.xlane.xlu0 %908 }
 0x5a5   :  { %v917_v10 = vmul.f32 1.442695, %v914_v8  ;;  %v913_v11 = vsub.f32 %v904_v40, %v909_v9 }
 0x5a7   :  { %1100 = vpow2.f32 %v917_v10  ;;  %v915_v12 = vmul.f32 1.442695, %v913_v11 }
 0x5a9   :  { %1102 = vpow2.f32 %v915_v12 }
 0x5b4   :  { %v1101_v13 = vpop.eup %1100 }
 0x5b5   :  { %v922_v14 = vsel %vm906_vm3, %v1101_v13, 0.0 }
 0x5b6   :  { %v1103_v15 = vpop.eup %1102  ;;  %923 = vadd.xlane.f32.xlu1 %v922_v14 }
 0x5b7   :  { %v919_v16 = vsel %vm906_vm3, %v1103_v15, 0.0 }
 0x5b8   :  { %920 = vadd.xlane.f32.xlu0 %v919_v16 }
 0x63f   :  { %v924_v17 = vpop.xlane.xlu1 %923 }
 0x640   :  { %1104 = vrcp.f32 %v924_v17 }
 0x641   :  { %v921_v18 = vpop.xlane.xlu0 %920 }
 0x642   :  { %1106 = vrcp.f32 %v921_v18 }
 0x64d   :  { %v1105_v19 = vpop.eup %1104 }
 0x64e   :  { %v928_v20 = vmul.f32 %v1105_v19, %v1101_v13 }
 0x64f   :  { %v1107_v21 = vpop.eup %1106 }
 0x650   :  { %930 = vst.msk [vmem:[%s1297_s8 + $0x8] sm:$0xff] %vm906_vm3, %v928_v20  ;;  %v926_v22 = vmul.f32 %v1107_v21, %v1103_v15 }
 0x652   :  { %929 = vst.msk [vmem:[%s1297_s8] sm:$0xff] %vm906_vm3, %v926_v22 }

</bundles_post_ra>
